<compile_context>
chip_gen: v7x
topology: tpu7x:2x2x1
jax: 0.10.0
libtpu: 0.0.40
codegen_flags: <defaults>
</compile_context>

<pallas_src>
import functools

import jax
import jax.numpy as jnp
from jax.experimental import pallas as pl
from jax.experimental.pallas import tpu as pltpu

ALPHA = 1.0
GAMMA = 2.0  # statically 2 -> explicit square inside the kernel


def focal_loss_kernel(logits_ref, tgt_ref, out_ref, *, total_n, tile_n):
    x = logits_ref[...].astype(jnp.float32)        # (T, C) f32 compute
    t = tgt_ref[...]                               # (T, 1) int32

    tn, c = x.shape

    # numerically-stable softmax pieces; exp(x - m) computed exactly once
    m = jnp.max(x, axis=-1, keepdims=True)         # (T, 1)
    e = jnp.exp(x - m)                             # (T, C)
    sumexp = jnp.sum(e, axis=-1, keepdims=True)    # (T, 1)

    # one-hot gather of the target column (class iota on lanes)
    cls_idx = jax.lax.broadcasted_iota(jnp.int32, (tn, c), 1)
    onehot = (cls_idx == t).astype(jnp.float32)    # (T, C)
    tgt_shift = jnp.sum((x - m) * onehot, axis=-1, keepdims=True)  # tgt_logit - m
    tgt_exp = jnp.sum(e * onehot, axis=-1, keepdims=True)          # exp(tgt_logit - m)

    # cross-entropy (reduction='none'); clamp tiny negative rounding noise
    ce = jnp.maximum(jnp.log(sumexp) - tgt_shift, 0.0)             # (T, 1)

    # pt = softmax prob of the target class, reusing e (no second exp(-ce)).
    # approx=True would route to the EUP approximation (~1e-3 rel error); this
    # is O(N) work, so keep it exact.
    pt = tgt_exp * pl.reciprocal(sumexp, approx=False)
    w = jnp.maximum(1.0 - pt, 0.0)

    focal = ALPHA * w * w * ce                     # gamma == 2 -> square, not pow

    # zero out padded rows of the final (remainder) tile
    row = jax.lax.broadcasted_iota(jnp.int32, (tn, 1), 0) + pl.program_id(0) * tile_n
    focal = jnp.where(row < total_n, focal, 0.0)

    out_ref[...] = focal


def focal_loss(logits, targets, *, tile_n=None):
    """logits: (N, C) float, targets: (N,) int -> scalar float32 (mean focal loss)."""
    n, c = logits.shape
    tgt2d = targets.astype(jnp.int32).reshape(n, 1)

    if tile_n is None:
        # Conservative per-row VMEM cost: 2 pipeline buffers of the input tile
        # plus ~4 f32 temporaries of the same width.  Keep the working set
        # around 12 MiB so it fits every TPU generation's scoped VMEM.
        per_row_bytes = c * (2 * logits.dtype.itemsize + 16)
        tile_n = (12 * 1024 * 1024) // max(per_row_bytes, 1)
        tile_n = max(8, min(2048, (tile_n // 8) * 8))
    if tile_n >= n:
        tile_n = n                                  # single block == full dims (always legal)
    else:
        tile_n = max(8, (tile_n // 8) * 8)          # sublane-aligned tile

    grid = (pl.cdiv(n, tile_n),)

    kernel = functools.partial(focal_loss_kernel, total_n=n, tile_n=tile_n)

    cost = pl.CostEstimate(
        flops=8 * n * c,
        transcendentals=n * c,                      # the exp(x - m) sweep dominates
        bytes_accessed=n * c * logits.dtype.itemsize + n * 4 + n * 4,
    )

    per_row = pl.pallas_call(
        kernel,
        out_shape=jax.ShapeDtypeStruct((n, 1), jnp.float32),
        grid_spec=pltpu.PrefetchScalarGridSpec(
            num_scalar_prefetch=0,
            grid=grid,
            in_specs=[
                pl.BlockSpec((tile_n, c), lambda i: (i, 0)),
                pl.BlockSpec((tile_n, 1), lambda i: (i, 0)),
            ],
            out_specs=pl.BlockSpec((tile_n, 1), lambda i: (i, 0)),
        ),
        compiler_params=pltpu.CompilerParams(
            dimension_semantics=("parallel",),
            vmem_limit_bytes=32 * 1024 * 1024,
        ),
        cost_estimate=cost,
    )(logits, tgt2d)

    # reduction='mean' over the true N (tiny reduce left to XLA)
    return jnp.sum(per_row) / n


def focal_loss_ref(logits, targets):
    # pure-JAX reference (matches F.cross_entropy + focal weighting)
    logp = jax.nn.log_softmax(logits.astype(jnp.float32), axis=-1)
    ce = -jnp.take_along_axis(logp, targets[:, None].astype(jnp.int32), axis=-1)[:, 0]
    pt = jnp.exp(-ce)
    return jnp.mean(ALPHA * (1.0 - pt) ** GAMMA * ce)


if __name__ == "__main__":
    key = jax.random.PRNGKey(0)
    k1, k2 = jax.random.split(key)
    # Small shapes; N deliberately NOT a multiple of the tile so the
    # remainder-masking / multi-tile grid path is exercised.
    N, C = 20, 32
    logits = jax.random.normal(k1, (N, C), dtype=jnp.float32)
    targets = jax.random.randint(k2, (N,), 0, C, dtype=jnp.int32)

    ref = focal_loss_ref(logits, targets)

    # tiled path: grid of 3 tiles, last one partial
    out = jax.block_until_ready(focal_loss(logits, targets, tile_n=8))
    assert jnp.allclose(out, ref, atol=1e-5, rtol=1e-4), (out, ref)

    # auto tile size (single-block path for this tiny problem)
    out2 = jax.block_until_ready(focal_loss(logits, targets))
    assert jnp.allclose(out2, ref, atol=1e-5, rtol=1e-4), (out2, ref)

    print("KERNEL_OK")
</pallas_src>

<mosaic_0001>
module attributes {stable_mosaic.version = 11 : i64} {
  func.func @focal_loss_kernel(%arg0: i32, %arg1: memref<8x32xf32, #tpu.memory_space<vmem>>, %arg2: memref<8x1xi32, #tpu.memory_space<vmem>>, %arg3: memref<8x1xf32, #tpu.memory_space<vmem>>) attributes {dimension_semantics = [#tpu.dimension_semantics<parallel>], iteration_bounds = array<i64: 3>, scalar_prefetch = 0 : i64, scratch_operands = 0 : i64, tpu.core_type = #tpu.core_type<tc>, window_params = [{transform_indices = @transform_0, window_bounds = array<i64: 8, 32>}, {transform_indices = @transform_1, window_bounds = array<i64: 8, 1>}, {transform_indices = @transform_2, window_bounds = array<i64: 8, 1>}]} {
    %c0 = arith.constant 0 : index
    %c0_0 = arith.constant 0 : index
    %0 = vector.load %arg1[%c0, %c0_0] : memref<8x32xf32, #tpu.memory_space<vmem>>, vector<8x32xf32>
    %c0_1 = arith.constant 0 : index
    %c0_2 = arith.constant 0 : index
    %1 = vector.load %arg2[%c0_1, %c0_2] : memref<8x1xi32, #tpu.memory_space<vmem>>, vector<8x1xi32>
    %cst = arith.constant dense<0xFF800000> : vector<8xf32>
    %2 = vector.multi_reduction <maximumf>, %0, %cst [1] : vector<8x32xf32> to vector<8xf32>
    %3 = vector.shape_cast %2 : vector<8xf32> to vector<8x1xf32>
    %4 = vector.broadcast %3 : vector<8x1xf32> to vector<8x32xf32>
    %5 = arith.subf %0, %4 : vector<8x32xf32>
    %6 = math.exp %5 : vector<8x32xf32>
    %cst_3 = arith.constant dense<0.000000e+00> : vector<8xf32>
    %7 = vector.multi_reduction <add>, %6, %cst_3 [1] : vector<8x32xf32> to vector<8xf32>
    %8 = vector.shape_cast %7 : vector<8xf32> to vector<8x1xf32>
    %9 = tpu.iota {dimensions = array<i32: 1>} : vector<8x32xi32>
    %10 = vector.broadcast %1 : vector<8x1xi32> to vector<8x32xi32>
    %11 = arith.cmpi eq, %9, %10 : vector<8x32xi32>
    %12 = arith.extui %11 : vector<8x32xi1> to vector<8x32xi32>
    %13 = arith.sitofp %12 : vector<8x32xi32> to vector<8x32xf32>
    %14 = vector.broadcast %3 : vector<8x1xf32> to vector<8x32xf32>
    %15 = arith.subf %0, %14 : vector<8x32xf32>
    %16 = arith.mulf %15, %13 : vector<8x32xf32>
    %cst_4 = arith.constant dense<0.000000e+00> : vector<8xf32>
    %17 = vector.multi_reduction <add>, %16, %cst_4 [1] : vector<8x32xf32> to vector<8xf32>
    %18 = vector.shape_cast %17 : vector<8xf32> to vector<8x1xf32>
    %19 = arith.mulf %6, %13 : vector<8x32xf32>
    %cst_5 = arith.constant dense<0.000000e+00> : vector<8xf32>
    %20 = vector.multi_reduction <add>, %19, %cst_5 [1] : vector<8x32xf32> to vector<8xf32>
    %21 = vector.shape_cast %20 : vector<8xf32> to vector<8x1xf32>
    %22 = math.log %8 : vector<8x1xf32>
    %23 = arith.subf %22, %18 : vector<8x1xf32>
    %cst_6 = arith.constant 0.000000e+00 : f32
    %24 = vector.broadcast %cst_6 : f32 to vector<8x1xf32>
    %25 = arith.maximumf %23, %24 : vector<8x1xf32>
    %26 = tpu.reciprocal %8 : vector<8x1xf32> -> vector<8x1xf32>
    %27 = arith.mulf %21, %26 : vector<8x1xf32>
    %cst_7 = arith.constant 1.000000e+00 : f32
    %28 = vector.broadcast %cst_7 : f32 to vector<8x1xf32>
    %29 = arith.subf %28, %27 : vector<8x1xf32>
    %cst_8 = arith.constant 0.000000e+00 : f32
    %30 = vector.broadcast %cst_8 : f32 to vector<8x1xf32>
    %31 = arith.maximumf %29, %30 : vector<8x1xf32>
    %cst_9 = arith.constant 1.000000e+00 : f32
    %32 = vector.broadcast %cst_9 : f32 to vector<8x1xf32>
    %33 = arith.mulf %32, %31 : vector<8x1xf32>
    %34 = arith.mulf %33, %31 : vector<8x1xf32>
    %35 = arith.mulf %34, %25 : vector<8x1xf32>
    %36 = tpu.iota {dimensions = array<i32: 0>} : vector<8x1xi32>
    %c8_i32 = arith.constant 8 : i32
    %37 = arith.muli %arg0, %c8_i32 : i32
    %38 = vector.broadcast %37 : i32 to vector<8x1xi32>
    %39 = arith.addi %36, %38 : vector<8x1xi32>
    %c20_i32 = arith.constant 20 : i32
    %40 = vector.broadcast %c20_i32 : i32 to vector<8x1xi32>
    %41 = arith.cmpi slt, %39, %40 : vector<8x1xi32>
    %cst_10 = arith.constant 0.000000e+00 : f32
    %42 = vector.broadcast %cst_10 : f32 to vector<8x1xf32>
    %43 = arith.select %41, %35, %42 : vector<8x1xi1>, vector<8x1xf32>
    %c0_11 = arith.constant 0 : index
    %c0_12 = arith.constant 0 : index
    %44 = vector.load %arg3[%c0_11, %c0_12] : memref<8x1xf32, #tpu.memory_space<vmem>>, vector<8x1xf32>
    tpu.vector_store %arg3[%c0_11, %c0_12], %43 {strides = array<i32>} : memref<8x1xf32, #tpu.memory_space<vmem>>, vector<8x1xf32>,
    return
  }
  func.func @transform_0(%arg0: i32) -> (i32, i32) {
    %c0_i32 = arith.constant 0 : i32
    %c0_i32_0 = arith.constant 0 : i32
    return %arg0, %c0_i32 : i32, i32
  }
  func.func @transform_1(%arg0: i32) -> (i32, i32) {
    %c0_i32 = arith.constant 0 : i32
    %c0_i32_0 = arith.constant 0 : i32
    return %arg0, %c0_i32 : i32, i32
  }
  func.func @transform_2(%arg0: i32) -> (i32, i32) {
    %c0_i32 = arith.constant 0 : i32
    %c0_i32_0 = arith.constant 0 : i32
    return %arg0, %c0_i32 : i32, i32
  }
}

</mosaic_0001>

<bundles_post_ra>
// kernel: tpu_custom_call.1
= control target key start
LH: loop header
LB: loop body
LE: loop exit
PB: predicated region body
PF: predicated region fallthrough
CT: control target
= control target key end

     0   :  { %s322_s9 = smov 0   ;;  %s356_s0 = inlined_call_operand.vmem [shape: f32[20,32], index: 0, kind: input, shape index: {}]   ;;  %s357_s1 = inlined_call_operand.vmem [shape: s32[20,1], index: 1, kind: input, shape index: {}]   ;;  %s358_s2 = inlined_call_operand.vmem [shape: f32[20,1], index: 2, kind: output, shape index: {}]  }
   0x1 LB: > { %s328_s10 = sadd.s32 4294967295, %s303_s9   ;;  %p272_p0 = scmp.ge.s32.totalorder %s303_s9, 1  ;;  %s303_s9 = sphi %s322_s9, %s12_s9  }
   0x2   : > { %p120_p1 = scmp.lt.s32.totalorder %s303_s9, 4 }
   0x4   : > { %p121_p2 = pnand %p272_p0, %p120_p1 }
   0x5   : > { %p144_p3 = scmp.lt.s32.totalorder (!%p121_p2), %s328_s10, 2  ;;  %v305_v0 = vmov (!%p121_p2), 0   ;;  %vm158_vm0 = vcmask (!%p121_p2), 261120   ;;  %v168_v7 = vlaneseq (!%p121_p2)  ;;  %v306_v11 = vmov (!%p121_p2), 0.0   ;;  %s277_s19 = sshll.u32 (!%p121_p2), %s328_s10, 3 }
   0x6   : > { %124 = sbr.rel (%p121_p2) target bundleno = 343 (0x157), region = 28  ;;  %290 = vset.pattern.permute.xlu0 (!%p121_p2), %v305_v0  ;;  %v197_v25 = vstv (!%p121_p2), %s277_s19  ;;  %vm201_vm3 = vcmask (!%p121_p2), 7168  }
   0x7   : > { %v169_v8 = vand.u32 (!%p121_p2), 127, %v168_v7  ;;  %v195_v22 = vshrl.u32 (!%p121_p2), %v168_v7, 7 }
   0x9   : > { %v198_v29 = vadd.s32 (!%p121_p2), %v197_v25, %v195_v22 }
   0xb   : > { %vm199_vm2 = vcmp.lt.s32.totalorder (!%p121_p2), %v198_v29, 20 }
   0xd   : > { %s145_s11 = scalar_select %p144_p3, %s328_s10, 2 }
   0xf   : > { %s334_s12 = sshll.u32 %s145_s11, 3 }
  0x10   : > { %s147_s15 = scalar_lea.vmem %s356_s0, %s334_s12  ;;  %s151_s18 = scalar_lea.vmem %s357_s1, %s334_s12 }
  0x11   : > { %v156_v1 = vld [vmem:[%s147_s15] sm:$0xff]  ;;  %s155_s22 = scalar_lea.vmem %s358_s2, %s334_s12 }
  0x12   : > { %v159_v2 = vsel %vm158_vm0, %v156_v1, -inf  ;;  %v157_v3 = vld [vmem:[%s151_s18] sm:$0xff] }
  0x13   : > { %160 = vmax.xlane.f32.xlu0 %v159_v2 }
  0x29   : > { %171 = vperm.xlu0 %290, %v157_v3  }
  0xa0   : > { %v161_v4 = vpop.xlane.xlu0 %160 }
  0xa1   : > { %v162_v5 = vsub.f32 %v156_v1, %v161_v4 }
  0xa3   : > { %v163_v6 = vmul.f32 1.442695, %v162_v5 }
  0xa5   : > { %291 = vpow2.f32 %v163_v6 }
  0xa8   : > { %v172_v9 = vpop.permute.xlu0 %171 }
  0xa9   : > { %vm173_vm1 = vcmp.eq.s32.totalorder %v169_v8, %v172_v9 }
  0xaa   : > { %v276_v12 = vsel %vm173_vm1, 1.0, %v306_v11 }
  0xab   : > { %v176_v16 = vmul.f32 %v276_v12, %v162_v5 }
  0xad   : > { %v177_v17 = vsel %vm158_vm0, %v176_v16, 0.0 }
  0xaf   : > { %v292_v10 = vpop.eup %291 }
  0xb0   : > { %v165_v13 = vsel %vm158_vm0, %v292_v10, 0.0  ;;  %v180_v14 = vmul.f32 %v292_v10, %v276_v12 }
  0xb1   : > { %166 = vadd.xlane.f32.xlu1 %v165_v13 }
  0xb2   : > { %v181_v15 = vsel %vm158_vm0, %v180_v14, 0.0 }
  0xb5   : > { %182 = vadd.xlane.f32.xlu1 %v181_v15 }
  0xb9   : > { %178 = vadd.xlane.f32.xlu1 %v177_v17 }
 0x13e   : > { %v167_v18 = vpop.xlane.xlu1 %166 }
 0x13f   : > { %293 = vlog2.f32 %v167_v18 }
 0x140   : > { %295 = vrcp.f32 %v167_v18 }
 0x142   : > { %v183_v19 = vpop.xlane.xlu1 %182 }
 0x146   : > { %v179_v26 = vpop.xlane.xlu1 %178 }
 0x149   : > { %v294_v20 = vpop.eup %293 }
 0x14a   : > { %v296_v21 = vpop.eup %295  ;;  %v185_v23 = vmul.f32 0.6931472, %v294_v20 }
 0x14b   : > { %v189_v24 = vmul.f32 %v296_v21, %v183_v19 }
 0x14c   : > { %v186_v28 = vsub.f32 %v185_v23, %v179_v26 }
 0x14d   : > { %v190_v27 = vsub.f32 1.0, %v189_v24 }
 0x14e   : > { %v187_v32 = vmax.f32 %v186_v28, 0.0 }
 0x14f   : > { %v191_v30 = vmax.f32 %v190_v27, 0.0 }
 0x151   : > { %v192_v31 = vmul.f32 %v191_v30, %v191_v30 }
 0x153   : > { %v193_v33 = vmul.f32 %v192_v31, %v187_v32 }
 0x155   : > { %v200_v34 = vsel %vm199_vm2, %v193_v33, 0.0 }
 0x156   : > { %202 = vst.msk [vmem:[%s155_s22] sm:$0xff] %vm201_vm3, %v200_v34 }
 0x157 PF: > { %s12_s9 = sadd.s32 1, %s303_s9  }
 0x158   : > { %p9_p4 = scmp.ge.s32.totalorder %s12_s9, 5  }
 0x15a   :  { %11 = sbr.rel (!%p9_p4) target bundleno = 1 (0x1), region = 61 }

</bundles_post_ra>
